<compile_context>
chip_gen: v5e
topology: v5e:2x2
jax: 0.10.0
libtpu: 0.0.40
codegen_flags: <defaults>
</compile_context>

<pallas_src>
import functools

import jax
import jax.numpy as jnp
from jax.experimental import pallas as pl
from jax.experimental.pallas import tpu as pltpu

IN_FEATURES = 2
OUT_FEATURES = 1


def _linear_kernel(w_ref, x_ref, o_ref):
    # w_ref : SMEM (IN,)  f32 scalars  (w[0,0], w[0,1] of the PyTorch weight)
    # x_ref : VMEM (IN, TM)  lane-dense tile of x^T
    # o_ref : VMEM (OUT, TM) lane-dense tile of y^T
    w0 = w_ref[0]
    w1 = w_ref[1]
    # 2-term FMA on the VPU: y^T = w0 * x^T[0] + w1 * x^T[1]
    o_ref[...] = (w0 * x_ref[0:1, :] + w1 * x_ref[1:2, :]).astype(o_ref.dtype)


@functools.partial(jax.jit, static_argnames=("tm",))
def torch_lr_forward(x, w, *, tm=2048):
    """x: (N, 2) f32, w: (1, 2) f32 (PyTorch Linear weight). Returns (N, 1)."""
    N, IN = x.shape
    OUT = w.shape[0]
    assert IN == IN_FEATURES and OUT == OUT_FEATURES

    # Pad N up to a lane multiple and pick the lane-tile size (multiple of 128).
    n_lanes = 128 * pl.cdiv(N, 128)
    block_n = min(tm, n_lanes)
    n_pad = block_n * pl.cdiv(n_lanes, block_n)
    grid = (n_pad // block_n,)

    # Lane-dense input: (IN, n_pad), batch on the 128-lane axis, zero padded.
    x_t = jnp.zeros((IN, n_pad), x.dtype).at[:, :N].set(x.T)
    w_flat = w.reshape(IN).astype(jnp.float32)  # (2,) scalars for SMEM

    y_t = pl.pallas_call(
        _linear_kernel,
        out_shape=jax.ShapeDtypeStruct((OUT, n_pad), x.dtype),
        grid_spec=pltpu.PrefetchScalarGridSpec(
            num_scalar_prefetch=0,
            grid=grid,
            in_specs=[
                # Tiny weight vector goes to SMEM (no VMEM vreg padding, no DMA slot).
                pl.BlockSpec(memory_space=pltpu.MemorySpace.SMEM),
                # Lane-dense x^T tiles: (2, block_n); sublane dim (=2) is full-extent.
                pl.BlockSpec((IN, block_n), lambda i: (0, i)),
            ],
            out_specs=pl.BlockSpec((OUT, block_n), lambda i: (0, i)),
        ),
        compiler_params=pltpu.CompilerParams(
            dimension_semantics=("parallel",),  # shards across TCs on v7x
        ),
        cost_estimate=pl.CostEstimate(
            flops=2 * N * IN * OUT,
            transcendentals=0,
            bytes_accessed=4 * (N * IN + IN * OUT + N * OUT),
        ),
    )(w_flat, x_t)

    # Undo the lane-dense layout: (1, n_pad) -> (N, 1).
    return y_t[:, :N].T


if __name__ == "__main__":
    key = jax.random.PRNGKey(0)
    kx, kw = jax.random.split(key)

    N = 8
    x = jax.random.normal(kx, (N, IN_FEATURES), dtype=jnp.float32)

    # PyTorch Linear default init: U(-1/sqrt(in), 1/sqrt(in)).
    bound = float(IN_FEATURES) ** -0.5
    w = jax.random.uniform(
        kw, (OUT_FEATURES, IN_FEATURES), dtype=jnp.float32,
        minval=-bound, maxval=bound,
    )

    # Small (module-sized) check.
    y = torch_lr_forward(x, w)
    jax.block_until_ready(y)
    y_ref = x @ w.T
    assert y.shape == (N, OUT_FEATURES)
    assert jnp.allclose(y, y_ref, atol=1e-5, rtol=1e-5)

    # Exercise the multi-tile (grid > 1) + padding path as well.
    N2 = 4100
    x2 = jax.random.normal(kx, (N2, IN_FEATURES), dtype=jnp.float32)
    y2 = torch_lr_forward(x2, w)
    jax.block_until_ready(y2)
    assert y2.shape == (N2, OUT_FEATURES)
    assert jnp.allclose(y2, x2 @ w.T, atol=1e-5, rtol=1e-5)

    print("KERNEL_OK")
</pallas_src>

<mosaic_0001>
module attributes {stable_mosaic.version = 11 : i64} {
  func.func @_linear_kernel(%arg0: i32, %arg1: memref<2xf32, #tpu.memory_space<smem>>, %arg2: memref<2x128xf32, #tpu.memory_space<vmem>>, %arg3: memref<1x128xf32, #tpu.memory_space<vmem>>) attributes {dimension_semantics = [#tpu.dimension_semantics<parallel>], iteration_bounds = array<i64: 1>, scalar_prefetch = 0 : i64, scratch_operands = 0 : i64, tpu.core_type = #tpu.core_type<tc>, window_params = [{transform_indices = @transform_0, window_bounds = array<i64: 2>}, {transform_indices = @transform_1, window_bounds = array<i64: 2, 128>}, {transform_indices = @transform_2, window_bounds = array<i64: 1, 128>}]} {
    %c0 = arith.constant 0 : index
    %0 = memref.load %arg1[%c0] : memref<2xf32, #tpu.memory_space<smem>>
    %c1 = arith.constant 1 : index
    %1 = memref.load %arg1[%c1] : memref<2xf32, #tpu.memory_space<smem>>
    %c0_0 = arith.constant 0 : index
    %c0_1 = arith.constant 0 : index
    %2 = vector.load %arg2[%c0_0, %c0_1] : memref<2x128xf32, #tpu.memory_space<vmem>>, vector<1x128xf32>
    %3 = vector.broadcast %0 : f32 to vector<1x128xf32>
    %4 = arith.mulf %3, %2 : vector<1x128xf32>
    %c1_2 = arith.constant 1 : index
    %c0_3 = arith.constant 0 : index
    %5 = vector.load %arg2[%c1_2, %c0_3] : memref<2x128xf32, #tpu.memory_space<vmem>>, vector<1x128xf32>
    %6 = vector.broadcast %1 : f32 to vector<1x128xf32>
    %7 = arith.mulf %6, %5 : vector<1x128xf32>
    %8 = arith.addf %4, %7 : vector<1x128xf32>
    %c0_4 = arith.constant 0 : index
    %c0_5 = arith.constant 0 : index
    %9 = vector.load %arg3[%c0_4, %c0_5] : memref<1x128xf32, #tpu.memory_space<vmem>>, vector<1x128xf32>
    tpu.vector_store %arg3[%c0_4, %c0_5], %8 {strides = array<i32>} : memref<1x128xf32, #tpu.memory_space<vmem>>, vector<1x128xf32>,
    return
  }
  func.func @transform_0(%arg0: i32) -> i32 {
    %c0_i32 = arith.constant 0 : i32
    %c0_i32_0 = arith.constant 0 : i32
    return %c0_i32 : i32
  }
  func.func @transform_1(%arg0: i32) -> (i32, i32) {
    %c0_i32 = arith.constant 0 : i32
    %c0_i32_0 = arith.constant 0 : i32
    return %c0_i32, %arg0 : i32, i32
  }
  func.func @transform_2(%arg0: i32) -> (i32, i32) {
    %c0_i32 = arith.constant 0 : i32
    %c0_i32_0 = arith.constant 0 : i32
    return %c0_i32, %arg0 : i32, i32
  }
}

</mosaic_0001>

<bundles_post_ra>
// kernel: torch_lr_forward.1
= control target key start
LH: loop header
LB: loop body
LE: loop exit
PB: predicated region body
PF: predicated region fallthrough
CT: control target
= control target key end

     0   :  { %7 = vsyncpa [#allocation3], 0  ;;  %s55_s12 = smov [#allocation2]   ;;  %s83_s0 = inlined_call_operand.vmem [shape: f32[2], index: 0, kind: input, shape index: {}]   ;;  %s84_s1 = inlined_call_operand.vmem [shape: f32[2,128], index: 1, kind: input, shape index: {}]   ;;  %s85_s2 = inlined_call_operand.vmem [shape: f32[1,128], index: 2, kind: output, shape index: {}]  }
   0x1   :  { %s13_s11 = sshll.u32 %s83_s0, 4  ;;  %s14_s11 = int_to_ptr.vmem [resolvable:$true] %s13_s11 }
   0x2   :  { %16 = dma.vmem_to_smem %s14_s11, 16, %s55_s12, [#allocation3]  }
   0x3   :  { %53 = dma.done.wait [#allocation3], 16  }
   0x4   :  { %54 = vsyncadd [#allocation3], 4294967280 }
   0x5   :  { %23 = sfence }
   0x6   :  { %s24_s13 = sld [smem:[#allocation2]]  ;;  %v26_v0 = vld [vmem:[%s84_s1] sm:$0x1]  ;;  %v29_v1 = vld [vmem:[%s84_s1 + $0x1] sm:$0x1] }
   0x7   :  { %s39_s14 = sld [smem:[#allocation2 + $0x1]] }
   0xc   :  { %v27_v2 = vstv %s24_s13 }
   0xd   :  { %v28_v3 = vmul.f32 %v27_v2, %v26_v0  ;;  %v30_v4 = vstv %s39_s14 }
   0xe   :  { %v31_v5 = vmul.f32 %v30_v4, %v29_v1 }
  0x10   :  { %v32_v6 = vadd.f32 %v31_v5, %v28_v3 }
  0x12   :  { %33 = vst [vmem:[%s85_s2] sm:$0x1] %v32_v6 }
  0x13   :  { %38 = vsyncpa [#allocation3], 1 }

</bundles_post_ra>
